<compile_context>
chip_gen: v6e
topology: v6e:2x2x1
jax: 0.10.0
libtpu: 0.0.40
codegen_flags: <defaults>
</compile_context>

<pallas_src>
import functools
import numpy as np
import jax
import jax.numpy as jnp
from jax import lax
from jax.experimental import pallas as pl
from jax.experimental.pallas import tpu as pltpu

BN_EPS = 1e-5
BN_SCALE = float(1.0 / np.sqrt(1.0 + BN_EPS))  # eval-mode BN with fresh running stats
LANE = 128
SUB = 8


def _round_up(x, m):
    return (x + m - 1) // m * m


def _default_vmem_limit():
    # v5e/v6e have 128 MiB physical VMEM -> 96 MiB scoped; v7x has 64 MiB -> 48 MiB.
    try:
        cap = int(pltpu.get_tpu_info().vmem_capacity_bytes)
    except Exception:
        cap = 128 * 1024 * 1024
    return int(min(96 * 1024 * 1024, cap * 3 // 4))


VMEM_LIMIT = _default_vmem_limit()
VMEM_BUDGET = VMEM_LIMIT * 7 // 8   # headroom for Mosaic internal scratch


# ----------------------------------------------------------------------------
# Pallas kernel 1: Conv2d (stride 1, 'same') + folded affine (+ReLU).
# Taps are static flat offsets into a width-padded, flattened activation.
# Accumulation happens in a local f32 value; o_ref is written exactly once.
# Small-Cin layers concatenate the taps on the lane axis (one fat-K GEMM).
# ----------------------------------------------------------------------------
def _conv_kernel(x_ref, w_ref, s_ref, b_ref, o_ref, *, taps, n_out, relu, fused):
    # x_ref: (Hp*Wp, Cin) bf16 (one batch; resident across Cout tiles)
    # w_ref: (T, Cin, TCout) or (T*Cin, TCout) bf16 ; s_ref/b_ref: (1, TCout) f32
    # o_ref: (n_out, TCout) bf16
    if fused:
        if len(taps) == 1:
            xk = x_ref[taps[0]:taps[0] + n_out, :]
        else:
            xk = jnp.concatenate(
                [x_ref[off:off + n_out, :] for off in taps], axis=-1)
        acc = jnp.dot(xk, w_ref[...], preferred_element_type=jnp.float32)
    else:
        acc = jnp.dot(x_ref[taps[0]:taps[0] + n_out, :], w_ref[0],
                      preferred_element_type=jnp.float32)
        for t in range(1, len(taps)):
            off = taps[t]
            acc = acc + jnp.dot(x_ref[off:off + n_out, :], w_ref[t],
                                preferred_element_type=jnp.float32)
    y = acc * s_ref[...] + b_ref[...]
    if relu:
        y = jnp.maximum(y, 0.0)
    o_ref[...] = y.astype(o_ref.dtype)


def conv2d_affine(x, w, scale, bias, *, dilation=1, relu=False):
    """Conv2d (stride 1, padding = dilation*(k//2)) + folded per-channel affine
    (conv bias + eval-mode BN) + optional ReLU.

    x: [B, H, W, Cin], w: [kh, kw, Cin, Cout], scale/bias: [Cout]."""
    B, H, W, Cin = x.shape
    kh, kw, _, Cout = w.shape
    d = dilation
    ph, pw = (kh // 2) * d, (kw // 2) * d
    T = kh * kw

    if T == 1:
        Hp, Wp = H, W                                   # 1x1: no padding at all
        xp = x
    else:
        # Round padded width to a multiple of 8 so the ky tap offsets (ky*Wp*d)
        # and n_out are sublane aligned.  Bottom pad of ph+1 is the tight bound:
        # max flat read = n_out-1 + 2*ph*Wp + 2*pw  <  (H + 2*ph + 1) * Wp.
        Wp = _round_up(W + 2 * pw, SUB)
        Hp = H + 2 * ph + 1
        xp = jnp.pad(x, ((0, 0), (ph, Hp - H - ph), (pw, Wp - W - pw), (0, 0)))
    xf = xp.reshape(B, Hp * Wp, Cin).astype(jnp.bfloat16)

    cout_p = _round_up(Cout, LANE)                       # lane-dense output
    s_p = jnp.pad(scale, (0, cout_p - Cout)).reshape(1, cout_p).astype(jnp.float32)
    b_p = jnp.pad(bias, (0, cout_p - Cout)).reshape(1, cout_p).astype(jnp.float32)

    n_out = H * Wp                                       # output rows (padded width)
    taps = tuple((ky * Wp + kx) * d for ky in range(kh) for kx in range(kw))
    # NOTE: the padded-width columns [W, Wp) per row are wasted MXU rows for the
    # large-dilation TFA convs; eliminating them needs per-ky row-block GEMMs.

    # Fuse all taps into one fat-K GEMM when K=Cin would under-fill the MXU.
    fused = (T == 1) or (T * Cin <= 576)

    # Cout tile: fit the VMEM budget (weights+outputs double-buffered) and keep
    # at least 2 parallel grid iterations for megacore.
    x_bytes = Hp * Wp * Cin * 2
    tco = 256 if cout_p % 256 == 0 else LANE
    tco = min(tco, cout_p)

    def _vmem_est(t):
        wgt = T * Cin * t * 2 * 2            # bf16 weights, double buffered
        out = n_out * t * 2 * 2              # bf16 outputs, double buffered
        aff = 2 * t * 4 * 2
        return 2 * x_bytes + wgt + out + aff

    while tco > LANE and (_vmem_est(tco) > VMEM_BUDGET
                          or B * (cout_p // tco) < 2):
        tco //= 2
    n_j = cout_p // tco
    # TODO(synk): at full module scale (Cin=3584 conv51) on v7x, an innermost
    # 'arbitrary' Cin grid axis with an f32 VMEM accumulator would be needed to
    # keep weight double-buffering under the 64 MiB physical VMEM.

    if fused:
        w_arr = jnp.pad(w.reshape(T * Cin, Cout),
                        ((0, 0), (0, cout_p - Cout))).astype(jnp.bfloat16)
        w_spec = pl.BlockSpec((T * Cin, tco), lambda b, j: (0, j))
    else:
        w_arr = jnp.pad(w.reshape(T, Cin, Cout),
                        ((0, 0), (0, 0), (0, cout_p - Cout))).astype(jnp.bfloat16)
        w_spec = pl.BlockSpec((T, Cin, tco), lambda b, j: (0, 0, j))

    out = pl.pallas_call(
        functools.partial(_conv_kernel, taps=taps, n_out=n_out,
                          relu=relu, fused=fused),
        out_shape=jax.ShapeDtypeStruct((B, n_out, cout_p), jnp.bfloat16),
        grid_spec=pltpu.PrefetchScalarGridSpec(
            num_scalar_prefetch=0,
            grid=(B, n_j),
            in_specs=[
                pl.BlockSpec((None, Hp * Wp, Cin), lambda b, j: (b, 0, 0)),
                w_spec,
                pl.BlockSpec((1, tco), lambda b, j: (0, j)),
                pl.BlockSpec((1, tco), lambda b, j: (0, j)),
            ],
            out_specs=pl.BlockSpec((None, n_out, tco), lambda b, j: (b, 0, j)),
        ),
        compiler_params=pltpu.CompilerParams(
            dimension_semantics=("parallel", "parallel"),
            vmem_limit_bytes=VMEM_LIMIT),
    )(xf, w_arr, s_p, b_p)

    out = out.reshape(B, H, Wp, cout_p)
    if Wp != W or cout_p != Cout:
        out = out[:, :, :W, :Cout]
    return out


# ----------------------------------------------------------------------------
# Pallas kernel 2: AvgPool2d(kernel=r2, stride=1, pad=r2//2, count_include_pad)
# Zero padding is built in a VMEM scratch (no padded HBM round trip); window
# sums via O(log r2) shift-and-add doubling, H axis first.
# ----------------------------------------------------------------------------
def _window_sum(a, axis, size):
    """out[i] = sum_{d < size} a[i + d] along `axis` (length shrinks by size-1)."""
    if size == 1:
        return a
    if size % 2 == 0:
        h = size // 2
        b = _window_sum(a, axis, h)
        n = a.shape[axis] - size + 1
        return (lax.slice_in_dim(b, 0, n, axis=axis) +
                lax.slice_in_dim(b, h, h + n, axis=axis))
    b = _window_sum(a, axis, size - 1)
    n = a.shape[axis] - size + 1
    return (lax.slice_in_dim(b, 0, n, axis=axis) +
            lax.slice_in_dim(a, size - 1, size - 1 + n, axis=axis))


def _avgpool_kernel(x_ref, o_ref, pad_ref, *, r2, p, h, w):
    # x_ref: (H, W, TC) bf16 ; pad_ref: (Hp, Wp, TC) f32 scratch ; o_ref bf16
    pad_ref[...] = jnp.zeros_like(pad_ref)
    pad_ref[p:p + h, p:p + w, :] = x_ref[...].astype(jnp.float32)
    s = _window_sum(pad_ref[...], 0, r2)        # H axis first (layout-aligned)
    s = _window_sum(s, 1, r2)                   # W axis: ~log2(r2) shifted adds
    o_ref[...] = (s * jnp.float32(1.0 / (r2 * r2))).astype(o_ref.dtype)


def avgpool2d(x, r2):
    B, H, W, C = x.shape
    p = r2 // 2
    Hp, Wp = H + 2 * p, W + 2 * p
    x = x.astype(jnp.bfloat16)
    tc = 256 if (C % 256 == 0 and C > 256) else C        # channel tiling for big C
    n_c = C // tc
    return pl.pallas_call(
        functools.partial(_avgpool_kernel, r2=r2, p=p, h=H, w=W),
        out_shape=jax.ShapeDtypeStruct((B, H, W, C), jnp.bfloat16),
        grid_spec=pltpu.PrefetchScalarGridSpec(
            num_scalar_prefetch=0,
            grid=(B, n_c),
            in_specs=[pl.BlockSpec((None, H, W, tc), lambda b, j: (b, 0, 0, j))],
            out_specs=pl.BlockSpec((None, H, W, tc), lambda b, j: (b, 0, 0, j)),
            scratch_shapes=[pltpu.VMEM((Hp, Wp, tc), jnp.float32)],
        ),
        compiler_params=pltpu.CompilerParams(
            dimension_semantics=("parallel", "parallel"),
            vmem_limit_bytes=VMEM_LIMIT),
    )(x)


# ----------------------------------------------------------------------------
# Bilinear resize (align_corners=True) as dense interpolation-matrix einsums
# (glue; tiny linear maps kept in plain JAX, run in bf16 to keep the big
# upsampled intermediate half-width in HBM).
# ----------------------------------------------------------------------------
def _interp_matrix_ac(n_in, n_out):
    m = np.zeros((n_out, n_in), np.float32)
    if n_in == 1:
        m[:, 0] = 1.0
        return jnp.asarray(m)
    for o in range(n_out):
        src = o * (n_in - 1) / (n_out - 1) if n_out > 1 else 0.0
        lo = min(int(np.floor(src)), n_in - 2)
        frac = src - lo
        m[o, lo] += 1.0 - frac
        m[o, lo + 1] += frac
    return jnp.asarray(m)


def bilinear_resize_ac(x, h_out, w_out):
    dt = x.dtype
    mh = _interp_matrix_ac(x.shape[1], h_out).astype(dt)
    mw = _interp_matrix_ac(x.shape[2], w_out).astype(dt)
    y = jnp.einsum('oh,bhwc->bowc', mh, x)
    y = jnp.einsum('pw,bowc->bopc', mw, y)
    return y.astype(dt)


# ----------------------------------------------------------------------------
# Deterministic parameter construction
# ----------------------------------------------------------------------------
def _kaiming(key, kh, kw, cin, cout):
    # kaiming_normal_(mode='fan_out', nonlinearity='relu')
    std = float(np.sqrt(2.0 / (kh * kw * cout)))
    return jax.random.normal(key, (kh, kw, cin, cout), jnp.float32) * std


def _conv_bias(key, kh, kw, cin, cout):
    bound = float(1.0 / np.sqrt(kh * kw * cin))
    return jax.random.uniform(key, (cout,), jnp.float32, -bound, bound)


def make_params(key, *, c_deep, c_inter, c_shallow, shortcut_dim, shortcut_k,
                aspp_outdim, num_classes):
    ks = list(jax.random.split(key, 20))

    def conv_bn(kw_, kb_, kh, kwid, cin, cout):
        w = _kaiming(kw_, kh, kwid, cin, cout)
        cb = _conv_bias(kb_, kh, kwid, cin, cout)
        scale = jnp.full((cout,), BN_SCALE, jnp.float32)
        bias = cb * BN_SCALE                      # BN(beta=0, mean=0) folded
        return (w, scale, bias)

    def conv_plain(kw_, kb_, kh, kwid, cin, cout):
        w = _kaiming(kw_, kh, kwid, cin, cout)
        cb = _conv_bias(kb_, kh, kwid, cin, cout)
        return (w, jnp.ones((cout,), jnp.float32), cb)

    p = {}
    p['tfa1'] = conv_bn(ks[0], ks[1], 3, 3, c_deep, c_inter)
    p['tfa2'] = conv_bn(ks[2], ks[3], 3, 3, c_inter, c_inter)
    p['tfa3'] = conv_bn(ks[4], ks[5], 3, 3, c_inter, c_inter)
    # conv51: bias=False, followed by BN
    w51 = _kaiming(ks[6], 3, 3, c_deep + 3 * c_inter, c_inter)
    p['conv51'] = (w51, jnp.full((c_inter,), BN_SCALE, jnp.float32),
                   jnp.zeros((c_inter,), jnp.float32))
    p['conv6'] = conv_plain(ks[7], ks[8], 1, 1, c_inter, aspp_outdim)
    p['shortcut'] = conv_bn(ks[9], ks[10], shortcut_k, shortcut_k,
                            c_shallow, shortcut_dim)
    p['cat1'] = conv_bn(ks[11], ks[12], 3, 3, aspp_outdim + shortcut_dim,
                        aspp_outdim)
    p['cat2'] = conv_bn(ks[13], ks[14], 3, 3, aspp_outdim, aspp_outdim)
    p['cls'] = conv_plain(ks[15], ks[16], 1, 1, aspp_outdim, num_classes)
    return p


# ----------------------------------------------------------------------------
# Forward pass (mirrors TKCNetv2.forward after the backbone)
# ----------------------------------------------------------------------------
def tkcnetv2_forward(x_nchw, deep_nchw, shallow_nchw, params):
    B, _, Hin, Win = x_nchw.shape
    deep = jnp.transpose(deep_nchw, (0, 2, 3, 1)).astype(jnp.bfloat16)      # NHWC
    shallow = jnp.transpose(shallow_nchw, (0, 2, 3, 1)).astype(jnp.bfloat16)
    p = params

    # ---- TFAHead, r1=[10,20,30], r2=[7,15,25] ----
    l1 = conv2d_affine(avgpool2d(deep, 7), *p['tfa1'], dilation=10, relu=True)
    l2 = conv2d_affine(avgpool2d(l1, 15), *p['tfa2'], dilation=20, relu=True)
    l3 = conv2d_affine(avgpool2d(l2, 25), *p['tfa3'], dilation=30, relu=True)
    tfa = jnp.concatenate([deep, l1, l2, l3], axis=-1)
    h = conv2d_affine(tfa, *p['conv51'], dilation=1, relu=True)
    h = conv2d_affine(h, *p['conv6'], dilation=1, relu=False)   # Dropout2d = id (eval)

    # ---- up4 (UpsamplingBilinear2d(scale_factor=4), align_corners=True) ----
    h = bilinear_resize_ac(h, h.shape[1] * 4, h.shape[2] * 4)   # stays bf16

    # ---- shortcut on the shallow backbone feature ----
    sc = conv2d_affine(shallow, *p['shortcut'], dilation=1, relu=True)

    # ---- cat_conv + cls_conv ----
    y = jnp.concatenate([h, sc], axis=-1)
    y = conv2d_affine(y, *p['cat1'], dilation=1, relu=True)     # Dropout(0.5) = id
    y = conv2d_affine(y, *p['cat2'], dilation=1, relu=True)     # Dropout(0.1) = id
    y = conv2d_affine(y, *p['cls'], dilation=1, relu=False)

    # ---- final interpolate to the input size, bilinear, align_corners=True ----
    y = bilinear_resize_ac(y, Hin, Win)
    return jnp.transpose(y, (0, 3, 1, 2)).astype(jnp.float32)    # back to NCHW


# ----------------------------------------------------------------------------
if __name__ == "__main__":
    # Small shapes consistent with the module (channel counts scaled down:
    # 2048 -> 64 deep, 256 -> 16 shallow, ASPP_OUTDIM -> 32, SHORTCUT_DIM -> 16)
    B, Hin, Win = 2, 64, 64
    C_DEEP = 64            # backbone layers[-1] channels (2048 in the module)
    C_INTER = C_DEEP // 4  # inter_channels = in_channels // 4
    C_SHALLOW = 16         # backbone layers[0] channels (256 in the module)
    SHORTCUT_DIM = 16      # cfg.MODEL_SHORTCUT_DIM (96 in the module)
    SHORTCUT_K = 1         # cfg.MODEL_SHORTCUT_KERNEL
    ASPP_OUTDIM = 32       # cfg.MODEL_ASPP_OUTDIM
    NUM_CLASSES = 5        # cfg.MODEL_NUM_CLASSES

    key = jax.random.PRNGKey(0)
    k_x, k_deep, k_shallow, k_params = jax.random.split(key, 4)

    x = jax.random.normal(k_x, (B, 3, Hin, Win), jnp.float32)
    # TODO(synk): the pretrained dilated ResNet backbone (build_backbone) is an
    # external module; its two feature maps (layers[0] @ stride 4,
    # layers[-1] @ stride 16) are synthesized deterministically here instead.
    deep = jax.random.normal(k_deep, (B, C_DEEP, Hin // 16, Win // 16), jnp.float32)
    shallow = jax.random.normal(k_shallow, (B, C_SHALLOW, Hin // 4, Win // 4),
                                jnp.float32)

    params = make_params(k_params, c_deep=C_DEEP, c_inter=C_INTER,
                         c_shallow=C_SHALLOW, shortcut_dim=SHORTCUT_DIM,
                         shortcut_k=SHORTCUT_K, aspp_outdim=ASPP_OUTDIM,
                         num_classes=NUM_CLASSES)

    out = tkcnetv2_forward(x, deep, shallow, params)
    out = jax.block_until_ready(out)
    assert out.shape == (B, NUM_CLASSES, Hin, Win), out.shape
    assert bool(jnp.all(jnp.isfinite(out)))
    print("KERNEL_OK")
</pallas_src>

<mosaic_0001>
module attributes {stable_mosaic.version = 11 : i64} {
  func.func @_avgpool_kernel(%arg0: i32, %arg1: i32, %arg2: memref<1x4x4x64xbf16, #tpu.memory_space<vmem>>, %arg3: memref<1x4x4x64xbf16, #tpu.memory_space<vmem>>, %arg4: memref<10x10x64xf32, #tpu.memory_space<vmem>>) attributes {dimension_semantics = [#tpu.dimension_semantics<parallel>, #tpu.dimension_semantics<parallel>], iteration_bounds = array<i64: 2, 1>, scalar_prefetch = 0 : i64, scratch_operands = 1 : i64, tpu.core_type = #tpu.core_type<tc>, window_params = [{transform_indices = @transform_0, window_bounds = array<i64: 1, 4, 4, 64>}, {transform_indices = @transform_1, window_bounds = array<i64: 1, 4, 4, 64>}]} {
    %cst = arith.constant 0.000000e+00 : f32
    %0 = vector.broadcast %cst : f32 to vector<10x10x64xf32>
    %c0 = arith.constant 0 : index
    %c0_0 = arith.constant 0 : index
    %c0_1 = arith.constant 0 : index
    %1 = vector.load %arg4[%c0, %c0_0, %c0_1] : memref<10x10x64xf32, #tpu.memory_space<vmem>>, vector<10x10x64xf32>
    tpu.vector_store %arg4[%c0, %c0_0, %c0_1], %0 {strides = array<i32>} : memref<10x10x64xf32, #tpu.memory_space<vmem>>, vector<10x10x64xf32>,
    %c0_2 = arith.constant 0 : index
    %c0_3 = arith.constant 0 : index
    %c0_4 = arith.constant 0 : index
    %c0_5 = arith.constant 0 : index
    %2 = vector.load %arg2[%c0_2, %c0_3, %c0_4, %c0_5] : memref<1x4x4x64xbf16, #tpu.memory_space<vmem>>, vector<1x4x4x64xbf16>
    %3 = vector.shape_cast %2 : vector<1x4x4x64xbf16> to vector<4x4x64xbf16>
    %4 = arith.extf %3 : vector<4x4x64xbf16> to vector<4x4x64xf32>
    %c3 = arith.constant 3 : index
    %c3_6 = arith.constant 3 : index
    %c0_7 = arith.constant 0 : index
    %5 = vector.load %arg4[%c3, %c3_6, %c0_7] : memref<10x10x64xf32, #tpu.memory_space<vmem>>, vector<4x4x64xf32>
    tpu.vector_store %arg4[%c3, %c3_6, %c0_7], %4 {strides = array<i32>} : memref<10x10x64xf32, #tpu.memory_space<vmem>>, vector<4x4x64xf32>,
    %c0_8 = arith.constant 0 : index
    %c0_9 = arith.constant 0 : index
    %c0_10 = arith.constant 0 : index
    %6 = vector.load %arg4[%c0_8, %c0_9, %c0_10] : memref<10x10x64xf32, #tpu.memory_space<vmem>>, vector<10x10x64xf32>
    %7 = vector.extract_strided_slice %6 {offsets = [0, 0, 0], sizes = [9, 10, 64], strides = [1, 1, 1]} : vector<10x10x64xf32> to vector<9x10x64xf32>
    %8 = vector.extract_strided_slice %6 {offsets = [1, 0, 0], sizes = [9, 10, 64], strides = [1, 1, 1]} : vector<10x10x64xf32> to vector<9x10x64xf32>
    %9 = arith.addf %7, %8 : vector<9x10x64xf32>
    %10 = vector.extract_strided_slice %9 {offsets = [0, 0, 0], sizes = [8, 10, 64], strides = [1, 1, 1]} : vector<9x10x64xf32> to vector<8x10x64xf32>
    %11 = vector.extract_strided_slice %6 {offsets = [2, 0, 0], sizes = [8, 10, 64], strides = [1, 1, 1]} : vector<10x10x64xf32> to vector<8x10x64xf32>
    %12 = arith.addf %10, %11 : vector<8x10x64xf32>
    %13 = vector.extract_strided_slice %12 {offsets = [0, 0, 0], sizes = [5, 10, 64], strides = [1, 1, 1]} : vector<8x10x64xf32> to vector<5x10x64xf32>
    %14 = vector.extract_strided_slice %12 {offsets = [3, 0, 0], sizes = [5, 10, 64], strides = [1, 1, 1]} : vector<8x10x64xf32> to vector<5x10x64xf32>
    %15 = arith.addf %13, %14 : vector<5x10x64xf32>
    %16 = vector.extract_strided_slice %15 {offsets = [0, 0, 0], sizes = [4, 10, 64], strides = [1, 1, 1]} : vector<5x10x64xf32> to vector<4x10x64xf32>
    %17 = vector.extract_strided_slice %6 {offsets = [6, 0, 0], sizes = [4, 10, 64], strides = [1, 1, 1]} : vector<10x10x64xf32> to vector<4x10x64xf32>
    %18 = arith.addf %16, %17 : vector<4x10x64xf32>
    %19 = vector.extract_strided_slice %18 {offsets = [0, 0, 0], sizes = [4, 9, 64], strides = [1, 1, 1]} : vector<4x10x64xf32> to vector<4x9x64xf32>
    %20 = vector.extract_strided_slice %18 {offsets = [0, 1, 0], sizes = [4, 9, 64], strides = [1, 1, 1]} : vector<4x10x64xf32> to vector<4x9x64xf32>
    %21 = arith.addf %19, %20 : vector<4x9x64xf32>
    %22 = vector.extract_strided_slice %21 {offsets = [0, 0, 0], sizes = [4, 8, 64], strides = [1, 1, 1]} : vector<4x9x64xf32> to vector<4x8x64xf32>
    %23 = vector.extract_strided_slice %18 {offsets = [0, 2, 0], sizes = [4, 8, 64], strides = [1, 1, 1]} : vector<4x10x64xf32> to vector<4x8x64xf32>
    %24 = arith.addf %22, %23 : vector<4x8x64xf32>
    %25 = vector.extract_strided_slice %24 {offsets = [0, 0, 0], sizes = [4, 5, 64], strides = [1, 1, 1]} : vector<4x8x64xf32> to vector<4x5x64xf32>
    %26 = vector.extract_strided_slice %24 {offsets = [0, 3, 0], sizes = [4, 5, 64], strides = [1, 1, 1]} : vector<4x8x64xf32> to vector<4x5x64xf32>
    %27 = arith.addf %25, %26 : vector<4x5x64xf32>
    %28 = vector.extract_strided_slice %27 {offsets = [0, 0, 0], sizes = [4, 4, 64], strides = [1, 1, 1]} : vector<4x5x64xf32> to vector<4x4x64xf32>
    %29 = vector.extract_strided_slice %18 {offsets = [0, 6, 0], sizes = [4, 4, 64], strides = [1, 1, 1]} : vector<4x10x64xf32> to vector<4x4x64xf32>
    %30 = arith.addf %28, %29 : vector<4x4x64xf32>
    %cst_11 = arith.constant 0.0204081628 : f32
    %31 = vector.broadcast %cst_11 : f32 to vector<4x4x64xf32>
    %32 = arith.mulf %30, %31 : vector<4x4x64xf32>
    %33 = arith.truncf %32 : vector<4x4x64xf32> to vector<4x4x64xbf16>
    %c0_12 = arith.constant 0 : index
    %c0_13 = arith.constant 0 : index
    %c0_14 = arith.constant 0 : index
    %c0_15 = arith.constant 0 : index
    %34 = vector.load %arg3[%c0_12, %c0_13, %c0_14, %c0_15] : memref<1x4x4x64xbf16, #tpu.memory_space<vmem>>, vector<1x4x4x64xbf16>
    %35 = vector.shape_cast %34 : vector<1x4x4x64xbf16> to vector<4x4x64xbf16>
    %36 = vector.shape_cast %33 : vector<4x4x64xbf16> to vector<1x4x4x64xbf16>
    tpu.vector_store %arg3[%c0_12, %c0_13, %c0_14, %c0_15], %36 {strides = array<i32>} : memref<1x4x4x64xbf16, #tpu.memory_space<vmem>>, vector<1x4x4x64xbf16>,
    return
  }
  func.func @transform_0(%arg0: i32, %arg1: i32) -> (i32, i32, i32, i32) {
    %c0_i32 = arith.constant 0 : i32
    %c0_i32_0 = arith.constant 0 : i32
    %c0_i32_1 = arith.constant 0 : i32
    return %arg0, %c0_i32, %c0_i32_0, %arg1 : i32, i32, i32, i32
  }
  func.func @transform_1(%arg0: i32, %arg1: i32) -> (i32, i32, i32, i32) {
    %c0_i32 = arith.constant 0 : i32
    %c0_i32_0 = arith.constant 0 : i32
    %c0_i32_1 = arith.constant 0 : i32
    return %arg0, %c0_i32, %c0_i32_0, %arg1 : i32, i32, i32, i32
  }
}

</mosaic_0001>

<bundles_post_ra>
// kernel: tpu_custom_call.1
= control target key start
LH: loop header
LB: loop body
LE: loop exit
PB: predicated region body
PF: predicated region fallthrough
CT: control target
= control target key end

     0   :  { %6 = vsyncpa [#allocation4], 0  ;;  %s868_s0 = inlined_call_operand.hbm [shape: bf16[2,4,4,64], index: 0, kind: input, shape index: {}]   ;;  %s869_s1 = inlined_call_operand.hbm [shape: bf16[2,4,4,64], index: 1, kind: output, shape index: {}]  }
   0x1   :  { %8 = vsyncpa [#allocation4 + $0x1], 0 }
   0x2   :  { %9 = vsyncpa [#allocation5], 0 }
   0x3   :  { %11 = vsyncpa [#allocation5 + $0x1], 0  ;;  %s662_s6 = smov 0   ;;  %s664_s7 = smov 0  }
   0x4   :  { %s666_s8 = smov 0   ;;  %s668_s9 = smov 0  }
   0x5   :  { %s670_s10 = smov 0   ;;  %s672_s11 = smov 0  }
   0x6 LB: > { %s451_s12 = sadd.s32 4294967295, %s643_s11   ;;  %s452_s13 = sadd.s32 4294967294, %s643_s11   ;;  %s643_s11 = sphi %s672_s11, %s17_s11   ;;  %s639_s10 = sphi %s670_s10, %s880_s10   ;;  %s635_s9 = sphi %s668_s9, %s879_s9   ;;  %s631_s8 = sphi %s666_s8, %s878_s8   ;;  %s627_s7 = sphi %s664_s7, %s877_s7   ;;  %s623_s6 = sphi %s662_s6, %s876_s6  }
   0x7   : > { %s29_s14 = sadd.s32 1, %s639_s10  ;;  %s38_s15 = sadd.s32 1, %s631_s8 }
   0x8   : > { %p31_p0 = scmp.ge.s32.totalorder %s29_s14, 2  ;;  %p45_p1 = scmp.ne.s32.totalorder %s631_s8, %s627_s7 }
   0x9   : > { %p46_p2 = scmp.eq.s32.totalorder %s643_s11, 0  ;;  %p51_p3 = scmp.ne.s32.totalorder %s627_s7, %s623_s6 }
   0xa   : > { %s882_s14 = smov (%p31_p0, %s29_s14), 0  ;;  %p52_p5 = scmp.eq.s32.totalorder %s451_s12, 0 }
   0xb   : > { %p703_p4 = por %p46_p2, %p45_p1  ;;  %s33_s17 = ssub.s32 %s639_s10, %s882_s14 }
   0xc   : > { %p77_p6 = scmp.eq.s32.totalorder %s451_s12, 1  ;;  %p36_p7 = scmp.eq.s32.totalorder %s33_s17, 0 }
   0xd   : > { %p709_p8 = por %p52_p5, %p51_p3  ;;  %p83_p10 = scmp.eq.s32.totalorder %s452_s13, 1 }
   0xe   : > { %p713_p9 = por %p77_p6, %p45_p1  ;;  %p480_p13 = scmp.lt.s32.totalorder %s643_s11, 2 }
   0xf   : > { %s718_s20 = scalar_select %p36_p7, %s631_s8, %s38_s15  }
  0x10   : > { %p720_p11 = por %p83_p10, %p51_p3  ;;  %s103_s22 = sand.u32 1, %s631_s8  }
  0x11   : > { %s455_s23 = sshll.u32 %s103_s22, 3  ;;  %s466_s24 = sshll.u32 %s639_s10, 7 }
  0x12   : > { %s114_s27 = scalar_lea.hbm %s868_s0, %s466_s24  ;;  %s107_s28 = scalar_lea.vmem [#allocation3], %s455_s23 }
  0x13   : > { %s115_s29 = sshll.u32 %s107_s28, 4  ;;  %p733_p0 = pnand %p480_p13, %p703_p4  ;;  %s116_s29 = int_to_ptr.vmem [resolvable:$true] %s115_s29 }
  0x14   : > { %p458_p1 = scmp.ge.s32.totalorder %s643_s11, 1  ;;  %s104_s2 = scalar_lea.sflag [#allocation4], %s103_s22 }
  0x15   : > { %p537_p2 = pneg %p733_p0  ;;  %s548_s3 = scalar_lea.vmem %s116_s29, 128 }
  0x16   : > { %p549_p3 = scmp.ne.s32.totalorder %s116_s29, %s548_s3  ;;  %s645_s4 = smov [#allocation3]  }
  0x17   : > { %s553_s5 = sshll.u32 %s645_s4, 4  ;;  %s554_s5 = int_to_ptr.vmem [resolvable:$false] %s553_s5 }
  0x18   : > { %p551_p5 = pnand %p549_p3, %p537_p2  ;;  %s555_s12 = scalar_lea.vmem %s554_s5, 256 }
  0x19   : > { %p556_p7 = scmp.lt.s32.totalorder %s116_s29, %s554_s5  ;;  %p557_p10 = scmp.lt.s32.totalorder %s555_s12, %s548_s3 }
  0x1a   : > { %p552_p6 = pneg %p551_p5 }
  0x1b   : > { %p558_p12 = por %p557_p10, %p556_p7 }
  0x1d   : > { %p559_p4 = pnand %p558_p12, %p552_p6 }
  0x1f   : > { %562 = shalt.err (!%p559_p4)
}
  0x20   : > { %s646_s13 = smov 32   ;;  %s647_s15 = smov 2  }
  0x21   : > { %475 = dma.hbm_to_vmem [thread:$0]  (!%p733_p0), %s114_s27, 128, %s116_s29, %s104_s2, %s646_s13, %s646_s13, %s647_s15  }
  0x22   : > { %p123_p13 = scmp.lt.s32.totalorder %s643_s11, 3 }
  0x24   : > { %p124_p2 = pnand %p458_p1, %p123_p13 }
  0x25   : > { %s746_s16 = sand.u32 (!%p124_p2), 1, %s627_s7  }
  0x26   : > { %127 = sbr.rel (%p124_p2) target bundleno = 104 (0x68), region = 24  ;;  %s459_s17 = sshll.u32 (!%p124_p2), %s746_s16, 3 }
  0x27   : > { %s130_s22 = scalar_lea.sflag (!%p124_p2), [#allocation4], %s746_s16  ;;  %s752_s23 = scalar_lea.vmem (!%p124_p2), [#allocation3], %s459_s17 }
  0x2b   : > { %614 = dma.done.wait (%p709_p8), %s130_s22, 128  }
  0x2c   : > { %616 = vsyncadd (%p709_p8), %s130_s22, 4294967168  ;;  %vm154_vm0 = vcmask 517120   ;;  %vm152_vm1 = vcmask 523264   ;;  %v648_v0 = vmov 0.0   ;;  %vm183_vm2 = vcmask 519168   ;;  %s151_s18 = scalar_lea.vmem [#allocation6], %s459_s17 }
  0x2d   : > { %155 = vst.msk [vmem:[#allocation2 + $0x8] sm:$0x3] %vm154_vm0, %v648_v0  ;;  %157 = vst.msk [vmem:[#allocation2 + $0x18] sm:$0x3] %vm154_vm0, %v648_v0  ;;  %v174_v1 = vld [vmem:[%s752_s23] sm:$0x3] }
  0x2e   : > { %159 = vst.msk [vmem:[#allocation2 + $0x28] sm:$0x3] %vm154_vm0, %v648_v0  ;;  %161 = vst.msk [vmem:[#allocation2 + $0x38] sm:$0x3] %vm154_vm0, %v648_v0  ;;  %v175_v2 = vld [vmem:[%s752_s23 + $0x2] sm:$0x3]  ;;  %v178_v4 = vunpack.c.l.bf16 %v174_v1 }
  0x2f   : > { %163 = vst.msk [vmem:[#allocation2 + $0x48] sm:$0x3] %vm154_vm0, %v648_v0  ;;  %165 = vst.msk [vmem:[#allocation2 + $0x58] sm:$0x3] %vm154_vm0, %v648_v0  ;;  %v176_v3 = vld [vmem:[%s752_s23 + $0x4] sm:$0x3]  ;;  %v179_v5 = vunpack.c.l.bf16 %v175_v2 }
  0x30   : > { %167 = vst.msk [vmem:[#allocation2 + $0x68] sm:$0x3] %vm154_vm0, %v648_v0  ;;  %169 = vst.msk [vmem:[#allocation2 + $0x78] sm:$0x3] %vm154_vm0, %v648_v0  ;;  %v180_v6 = vunpack.c.l.bf16 %v176_v3  ;;  %v177_v7 = vld [vmem:[%s752_s23 + $0x6] sm:$0x3] }
  0x31   : > { %171 = vst.msk [vmem:[#allocation2 + $0x88] sm:$0x3] %vm154_vm0, %v648_v0  ;;  %173 = vst.msk [vmem:[#allocation2 + $0x98] sm:$0x3] %vm154_vm0, %v648_v0  ;;  %v181_v9 = vunpack.c.l.bf16 %v177_v7  ;;  %vm260_vm3 = vcmask 1046528   ;;  %vm281_vm4 = vcmask 1045504  }
  0x32   : > { %153 = vst.msk [vmem:[#allocation2] sm:$0xff] %vm152_vm1, %v648_v0  ;;  %156 = vst.msk [vmem:[#allocation2 + $0x10] sm:$0xff] %vm152_vm1, %v648_v0  ;;  %vm318_vm5 = vcmask 1041408   ;;  %s366_s24 = sshll.u32 %s151_s18, 4  ;;  %s467_s25 = sshll.u32 %s635_s9, 7  ;;  %s813_s24 = int_to_ptr.vmem [resolvable:$true] %s366_s24 }
  0x33   : > { %158 = vst.msk [vmem:[#allocation2 + $0x20] sm:$0xff] %vm152_vm1, %v648_v0  ;;  %160 = vst.msk [vmem:[#allocation2 + $0x30] sm:$0xff] %vm152_vm1, %v648_v0  ;;  %s818_s28 = scalar_lea.hbm %s869_s1, %s467_s25  ;;  %s352_s9 = scalar_lea.sflag [#allocation5], %s746_s16 }
  0x34   : > { %162 = vst.msk [vmem:[#allocation2 + $0x40] sm:$0xff] %vm152_vm1, %v648_v0  ;;  %164 = vst.msk [vmem:[#allocation2 + $0x50] sm:$0xff] %vm152_vm1, %v648_v0  ;;  %v189_v8 = vld [vmem:[#allocation2 + $0x8] sm:$0x3]  ;;  %v191_v10 = vld [vmem:[#allocation2 + $0x18] sm:$0x3] }
  0x35   : > { %166 = vst.msk [vmem:[#allocation2 + $0x60] sm:$0xff] %vm152_vm1, %v648_v0  ;;  %168 = vst.msk [vmem:[#allocation2 + $0x70] sm:$0xff] %vm152_vm1, %v648_v0  ;;  %v193_v11 = vld [vmem:[#allocation2 + $0x28] sm:$0x3]  ;;  %v195_v12 = vld [vmem:[#allocation2 + $0x38] sm:$0x3]  ;;  %v209_v14 = vadd.f32 %v191_v10, %v189_v8 }
  0x36   : > { %170 = vst.msk [vmem:[#allocation2 + $0x80] sm:$0xff] %vm152_vm1, %v648_v0  ;;  %172 = vst.msk [vmem:[#allocation2 + $0x90] sm:$0xff] %vm152_vm1, %v648_v0  ;;  %v197_v13 = vld [vmem:[#allocation2 + $0x48] sm:$0x3]  ;;  %v199_v15 = vld [vmem:[#allocation2 + $0x58] sm:$0x3]  ;;  %v211_v18 = vadd.f32 %v193_v11, %v191_v10  ;;  %v213_v19 = vadd.f32 %v195_v12, %v193_v11 }
  0x37   : > { %184 = vst.msk [vmem:[#allocation2 + $0x33] sm:$0xf] %vm183_vm2, %v178_v4  ;;  %185 = vst.msk [vmem:[#allocation2 + $0x43] sm:$0xf] %vm183_vm2, %v179_v5  ;;  %v201_v16 = vld [vmem:[#allocation2 + $0x68] sm:$0x3]  ;;  %v215_v17 = vadd.f32 %v197_v13, %v195_v12  ;;  %v223_v22 = vadd.f32 %v209_v14, %v193_v11  ;;  %v217_v24 = vadd.f32 %v199_v15, %v197_v13 }
  0x38   : > { %186 = vst.msk [vmem:[#allocation2 + $0x53] sm:$0xf] %vm183_vm2, %v180_v6  ;;  %187 = vst.msk [vmem:[#allocation2 + $0x63] sm:$0xf] %vm183_vm2, %v181_v9  ;;  %v203_v23 = vld [vmem:[#allocation2 + $0x78] sm:$0x3]  ;;  %v219_v25 = vadd.f32 %v201_v16, %v199_v15  ;;  %v225_v29 = vadd.f32 %v211_v18, %v195_v12  ;;  %v227_v33 = vadd.f32 %v213_v19, %v197_v13 }
  0x39   : > { %v188_v20 = vld [vmem:[#allocation2] sm:$0xff]  ;;  %v190_v21 = vld [vmem:[#allocation2 + $0x10] sm:$0xff]  ;;  %v229_v27 = vadd.f32 %v215_v17, %v199_v15  ;;  %v221_v28 = vadd.f32 %v203_v23, %v201_v16  ;;  %v231_v30 = vadd.f32 %v217_v24, %v201_v16  ;;  %v205_v31 = vld [vmem:[#allocation2 + $0x88] sm:$0x3]  ;;  %s563_s29 = scalar_lea.vmem %s813_s24, 128  ;;  %s649_s30 = smov [#allocation6]  }
  0x3a   : > { %v192_v26 = vld [vmem:[#allocation2 + $0x20] sm:$0xff]  ;;  %v208_v32 = vadd.f32 %v190_v21, %v188_v20  ;;  %v233_v34 = vadd.f32 %v219_v25, %v203_v23  ;;  %v207_v61 = vld [vmem:[#allocation2 + $0x98] sm:$0x3]  ;;  %p564_p8 = scmp.ne.s32.totalorder %s813_s24, %s563_s29  ;;  %s567_s2 = sshll.u32 %s649_s30, 4  ;;  %s568_s2 = int_to_ptr.vmem [resolvable:$false] %s567_s2 }
  0x3b   : > { %v237_v35 = vadd.f32 %v229_v27, %v223_v22  ;;  %v210_v36 = vadd.f32 %v192_v26, %v190_v21  ;;  %v235_v40 = vadd.f32 %v221_v28, %v205_v31  ;;  %v239_v45 = vadd.f32 %v231_v30, %v225_v29  ;;  %s569_s3 = scalar_lea.vmem %s568_s2, 256  ;;  %p570_p1 = scmp.lt.s32.totalorder %s813_s24, %s568_s2 }
  0x3c   : > { %v202_v43 = vld [vmem:[#allocation2 + $0x70] sm:$0xff]  ;;  %v222_v46 = vadd.f32 %v208_v32, %v192_v26  ;;  %v241_v48 = vadd.f32 %v233_v34, %v227_v33  ;;  %p565_p12 = pnand %p564_p8, %p713_p9  ;;  %p571_p3 = scmp.lt.s32.totalorder %s569_s3, %s563_s29 }
  0x3d   : > { %v786_v50 = vadd.f32 %v237_v35, %v201_v16  ;;  %v204_v53 = vld [vmem:[#allocation2 + $0x80] sm:$0xff]  ;;  %v243_v57 = vadd.f32 %v235_v40, %v229_v27  ;;  %v247_v60 = vadd.f32 %v239_v45, %v203_v23  ;;  %v206_v4 = vld [vmem:[#allocation2 + $0x90] sm:$0xff] }
  0x3e   : > { %v194_v37 = vld [vmem:[#allocation2 + $0x30] sm:$0xff]  ;;  %v196_v38 = vld [vmem:[#allocation2 + $0x40] sm:$0xff]  ;;  %v789_v3 = vadd.f32 %v241_v48, %v205_v31  ;;  %p566_p0 = pneg %p565_p12  ;;  %p572_p5 = por %p571_p3, %p570_p1 }
  0x3f   : > { %v198_v39 = vld [vmem:[#allocation2 + $0x50] sm:$0xff]  ;;  %v200_v41 = vld [vmem:[#allocation2 + $0x60] sm:$0xff]  ;;  %v214_v42 = vadd.f32 %v196_v38, %v194_v37  ;;  %v212_v47 = vadd.f32 %v194_v37, %v192_v26  ;;  %v224_v51 = vadd.f32 %v210_v36, %v194_v37  ;;  %v262_v1 = vrot.slane %v786_v50, 1 }
  0x40   : > { %v216_v44 = vadd.f32 %v198_v39, %v196_v38  ;;  %v218_v54 = vadd.f32 %v200_v41, %v198_v39  ;;  %v220_v55 = vadd.f32 %v202_v43, %v200_v41  ;;  %v283_v5 = vrot.slane %v786_v50, 2  ;;  %p573_p6 = pnand %p572_p5, %p566_p0 }
  0x41   : > { %v228_v49 = vadd.f32 %v214_v42, %v198_v39  ;;  %v226_v56 = vadd.f32 %v212_v47, %v196_v38  ;;  %v251_v8 = vadd.f32 %v243_v57, %v207_v61  ;;  %v265_v12 = vrot.slane %v247_v60, 1 }
  0x42   : > { %v230_v52 = vadd.f32 %v216_v44, %v200_v41  ;;  %v232_v62 = vadd.f32 %v218_v54, %v202_v43  ;;  %v234_v63 = vadd.f32 %v220_v55, %v204_v53  ;;  %v286_v14 = vrot.slane %v247_v60, 2 }
  0x43   : > { %v236_v58 = vadd.f32 %v228_v49, %v222_v46  ;;  %v268_v19 = vrot.slane %v789_v3, 1  ;;  %v289_v20 = vrot.slane %v789_v3, 2  ;;  %v271_v24 = vrot.slane %v251_v8, 1 }
  0x44   : > { %v238_v59 = vadd.f32 %v230_v52, %v224_v51  ;;  %v240_v6 = vadd.f32 %v232_v62, %v226_v56  ;;  %v242_v7 = vadd.f32 %v234_v63, %v228_v49  ;;  %v292_v36 = vrot.slane %v251_v8, 2 }
  0x45   : > { %v244_v0 = vadd.f32 %v236_v58, %v200_v41  ;;  %v320_v41 = vrot.slane %v786_v50, 6  ;;  %v323_v42 = vrot.slane %v247_v60, 6  ;;  %v326_v57 = vrot.slane %v789_v3, 6 }
  0x46   : > { %v246_v2 = vadd.f32 %v238_v59, %v202_v43  ;;  %v248_v15 = vadd.f32 %v240_v6, %v204_v53  ;;  %v250_v16 = vadd.f32 %v242_v7, %v206_v4  ;;  %v329_v58 = vrot.slane %v251_v8, 6 }
  0x47   : > { %v261_v9 = vrot.slane %v244_v0, 1  ;;  %v282_v10 = vrot.slane %v244_v0, 2  ;;  %v319_v30 = vrot.slane %v244_v0, 6 }
  0x48   : > { %v264_v11 = vrot.slane %v246_v2, 1  ;;  %v285_v13 = vrot.slane %v246_v2, 2  ;;  %v267_v26 = vrot.slane %v248_v15, 1  ;;  %v288_v27 = vrot.slane %v248_v15, 2 }
  0x49   : > { %v263_v17 = vsel %vm260_vm3, %v261_v9, %v262_v1  ;;  %v284_v22 = vsel %vm281_vm4, %v282_v10, %v283_v5  ;;  %v270_v28 = vrot.slane %v250_v16, 1  ;;  %v291_v32 = vrot.slane %v250_v16, 2 }
  0x4a   : > { %v266_v18 = vsel %vm260_vm3, %v264_v11, %v265_v12  ;;  %v277_v21 = vadd.f32 %v263_v17, %v244_v0  ;;  %v287_v25 = vsel %vm281_vm4, %v285_v13, %v286_v14  ;;  %v322_v33 = vrot.slane %v246_v2, 6 }
  0x4b   : > { %v278_v23 = vadd.f32 %v266_v18, %v246_v2  ;;  %v269_v34 = vsel %vm260_vm3, %v267_v26, %v268_v19  ;;  %v272_v35 = vsel %vm260_vm3, %v270_v28, %v271_v24  ;;  %v290_v43 = vsel %vm281_vm4, %v288_v27, %v289_v20 }
  0x4c   : > { %v298_v29 = vadd.f32 %v284_v22, %v277_v21  ;;  %v279_v39 = vadd.f32 %v269_v34, %v248_v15  ;;  %v280_v40 = vadd.f32 %v272_v35, %v250_v16  ;;  %v293_v44 = vsel %vm281_vm4, %v291_v32, %v292_v36 }
  0x4d   : > { %v299_v31 = vadd.f32 %v287_v25, %v278_v23  ;;  %v321_v49 = vsel %vm318_vm5, %v319_v30, %v320_v41  ;;  %v324_v51 = vsel %vm318_vm5, %v322_v33, %v323_v42  ;;  %v325_v52 = vrot.slane %v248_v15, 6 }
  0x4e   : > { %v306_v37 = vrot.slane %v298_v29, 3  ;;  %v300_v47 = vadd.f32 %v290_v43, %v279_v39  ;;  %v301_v48 = vadd.f32 %v293_v44, %v280_v40  ;;  %v328_v53 = vrot.slane %v250_v16, 6 }
  0x4f   : > { %v307_v38 = vrot.slane %v299_v31, 3  ;;  %v327_v63 = vsel %vm318_vm5, %v325_v52, %v326_v57 }
  0x50   : > { %v314_v45 = vadd.f32 %v306_v37, %v298_v29  ;;  %v308_v56 = vrot.slane %v300_v47, 3  ;;  %v309_v50 = vrot.slane %v301_v48, 3  ;;  %v330_v0 = vsel %vm318_vm5, %v328_v53, %v329_v58 }
  0x51   : > { %v315_v46 = vadd.f32 %v307_v38, %v299_v31 }
  0x52   : > { %v335_v54 = vadd.f32 %v321_v49, %v314_v45  ;;  %v316_v61 = vadd.f32 %v308_v56, %v300_v47  ;;  %v317_v62 = vadd.f32 %v309_v50, %v301_v48 }
  0x53   : > { %v336_v55 = vadd.f32 %v324_v51, %v315_v46 }
  0x54   : > { %v339_v59 = vmul.f32 0.020408163, %v335_v54  ;;  %v337_v4 = vadd.f32 %v327_v63, %v316_v61  ;;  %v338_v5 = vadd.f32 %v330_v0, %v317_v62 }
  0x55   : > { %v340_v60 = vmul.f32 0.020408163, %v336_v55 }
  0x56   : > { %v343_v1 = vpack.c.bf16 %v339_v59, %v339_v59  ;;  %v341_v3 = vmul.f32 0.020408163, %v337_v4  ;;  %v342_v6 = vmul.f32 0.020408163, %v338_v5 }
  0x57   : > { %v344_v2 = vpack.c.bf16 %v340_v60, %v340_v60 }
  0x58   : > { %347 = vst.msk [vmem:[%s151_s18] sm:$0x3] %vm154_vm0, %v343_v1  ;;  %v345_v7 = vpack.c.bf16 %v341_v3, %v341_v3  ;;  %v346_v8 = vpack.c.bf16 %v342_v6, %v342_v6 }
  0x59   : > { %348 = vst.msk [vmem:[%s151_s18 + $0x2] sm:$0x3] %vm154_vm0, %v344_v2 }
  0x5a   : > { %349 = vst.msk [vmem:[%s151_s18 + $0x4] sm:$0x3] %vm154_vm0, %v345_v7  ;;  %350 = vst.msk [vmem:[%s151_s18 + $0x6] sm:$0x3] %vm154_vm0, %v346_v8 }
  0x5b   : > { %576 = shalt.err (!%p573_p6)
}
  0x5c   : > { %s577_s4 = scalar_lea.hbm %s818_s28, 128  ;;  %s581_s13 = scalar_lea.hbm %s869_s1, 256 }
  0x5d   : > { %p578_p7 = scmp.ne.s32.totalorder %s818_s28, %s577_s4  ;;  %p582_p13 = scmp.lt.s32.totalorder %s818_s28, %s869_s1 }
  0x5e   : > { %p583_p2 = scmp.lt.s32.totalorder %s581_s13, %s577_s4 }
  0x5f   : > { %p579_p10 = pnand %p578_p7, %p713_p9 }
  0x60   : > { %p584_p8 = por %p583_p2, %p582_p13 }
  0x61   : > { %p580_p4 = pneg %p579_p10 }
  0x63   : > { %p585_p12 = pnand %p584_p8, %p580_p4 }
  0x65   : > { %588 = shalt.err (!%p585_p12)
}
  0x66   : > { %s650_s22 = smov 32   ;;  %s651_s23 = smov 2  }
  0x67   : > { %470 = dma.vmem_to_hbm [thread:$0]  (%p713_p9), %s813_s24, 128, %s818_s28, %s352_s9, %s650_s22, %s650_s22, %s651_s23  }
  0x68 PF: > { %s381_s18 = sand.u32 1, %s623_s6   ;;  %p875_p0 = scmp.ge.s32.totalorder %s643_s11, 2 }
  0x69   : > { %s382_s25 = scalar_lea.sflag [#allocation5], %s381_s18 }
  0x6a   : > { %p477_p1 = pnand %p875_p0, %p720_p11 }
  0x6c   : > { %p478_p3 = pneg %p477_p1 }
  0x6e   : > { %618 = dma.done.wait (%p478_p3), %s382_s25, 128  }
  0x6f   : > { %620 = vsyncadd (%p478_p3), %s382_s25, 4294967168  ;;  %s17_s11 = sadd.s32 1, %s643_s11   ;;  %s876_s6 = smov %s627_s7 }
  0x70   : > { %p14_p5 = scmp.ge.s32.totalorder %s17_s11, 4   ;;  %s877_s7 = smov %s631_s8 }
  0x71   : > { %s878_s8 = smov %s718_s20  ;;  %s879_s9 = smov %s639_s10 }
  0x72   : > { %s880_s10 = smov %s882_s14  ;;  %16 = sbr.rel (!%p14_p5) target bundleno = 6 (0x6), region = 70 }
  0x77   :  { %387 = vsyncpa [#allocation4], 1 }
  0x78   :  { %389 = vsyncpa [#allocation4 + $0x1], 1 }
  0x79   :  { %390 = vsyncpa [#allocation5], 1 }
  0x7a   :  { %392 = vsyncpa [#allocation5 + $0x1], 1 }

</bundles_post_ra>
